<compile_context>
chip_gen: v7x
topology: tpu7x:2x2x1
jax: 0.10.0
libtpu: 0.0.40
codegen_flags: <defaults>
</compile_context>

<pallas_src>
import math

import jax
import jax.numpy as jnp
from jax import lax
from jax.experimental import pallas as pl
from jax.experimental.pallas import tpu as pltpu

# ----------------------------- sizes ---------------------------------------
B, S, H = 2, 8, 64          # batch, seq, hidden_size (d_model)
NHEAD = 8                   # nn.TransformerEncoderLayer(nhead=8)
DH = H // NHEAD             # head dim
FF = 2048                   # default dim_feedforward of TransformerEncoderLayer
NLAYERS = 6                 # nn.TransformerEncoder(num_layers=6)
VOCAB = 128                 # config.vocab_size
LN_EPS = 1e-5
NEG_INF = -1e30


# --------------------------- kernels ----------------------------------------
def _layernorm(x, gamma, beta):
    mu = jnp.mean(x, axis=-1, keepdims=True)
    var = jnp.mean((x - mu) ** 2, axis=-1, keepdims=True)
    return (x - mu) * lax.rsqrt(var + LN_EPS) * gamma + beta


def encoder6_kernel(x_ref, mask_ref,
                    wqkv_ref, bqkv_ref, wo_ref, bo_ref,
                    w1_ref, b1_ref, w2_ref, b2_ref,
                    g1_ref, be1_ref, g2_ref, be2_ref,
                    out_ref, h_ref):
    """All 6 post-norm nn.TransformerEncoderLayer's; grid axis = layer index.

    The running activation (B*S, H) persists in the VMEM scratch `h_ref`;
    per-layer weights are streamed in via the layer grid axis.
    """
    f32 = jnp.float32
    l = pl.program_id(0)

    @pl.when(l == 0)
    def _():
        h_ref[...] = x_ref[...].reshape(B * S, H)

    x = h_ref[...]                                          # (B*S, H)

    # ---- fused QKV projection (one MXU matmul) ------------------------------
    qkv = jnp.dot(x, wqkv_ref[0], preferred_element_type=f32) + bqkv_ref[0]
    scale = 1.0 / math.sqrt(DH)
    q = (qkv[:, :H] * scale).reshape(B, S, H)
    k = qkv[:, H:2 * H].reshape(B, S, H)
    v = qkv[:, 2 * H:].reshape(B, S, H)

    # key-padding mask as an additive bias, computed once (mask==1 -> masked)
    bias = mask_ref[...] * NEG_INF                          # (B, 1, S)

    # ---- attention: batched over B, static loop over heads ------------------
    # TODO(synk): a single 4-D head-batched einsum would also drop the head
    # loop, but the required 4-D transposes are riskier to lower; this 3-D
    # batched form matches the proven flash-attention pattern.
    head_outs = []
    for h in range(NHEAD):
        sl = slice(h * DH, (h + 1) * DH)
        qh, kh, vh = q[:, :, sl], k[:, :, sl], v[:, :, sl]  # (B, S, DH)
        s = jnp.einsum('bqd,bkd->bqk', qh, kh,
                       preferred_element_type=f32)          # (B, S, S)
        s = s + bias                                        # broadcast over q
        p = jax.nn.softmax(s, axis=-1)
        head_outs.append(jnp.einsum('bqk,bkd->bqd', p, vh,
                                    preferred_element_type=f32))
    ao = jnp.concatenate(head_outs, axis=-1).reshape(B * S, H)

    attn = jnp.dot(ao, wo_ref[0], preferred_element_type=f32) + bo_ref[0]
    x1 = _layernorm(x + attn, g1_ref[0], be1_ref[0])

    # ---- feed-forward (B folded into M: (16,64)x(64,2048), (16,2048)x(2048,64))
    ff = jnp.maximum(
        jnp.dot(x1, w1_ref[0], preferred_element_type=f32) + b1_ref[0], 0.0)
    ff = jnp.dot(ff, w2_ref[0], preferred_element_type=f32) + b2_ref[0]
    h_new = _layernorm(x1 + ff, g2_ref[0], be2_ref[0])

    h_ref[...] = h_new

    @pl.when(l == pl.num_programs(0) - 1)
    def _():
        out_ref[...] = h_new.reshape(B, S, H)


def classifier_loss_kernel(x_ref, w_ref, b_ref, labels_ref, mask_ref,
                           logits_ref, loss_ref):
    """Fused: logits = x @ W + b  and  CrossEntropyLoss(ignore_index=-100,
    reduction='mean') with `active_labels = where(mask==1, labels, -100)`."""
    f32 = jnp.float32
    logits = jnp.dot(x_ref[...], w_ref[...],
                     preferred_element_type=f32) + b_ref[...]   # (N, V)
    logits_ref[...] = logits

    labels = labels_ref[...]                         # (N, 1) int32
    mask = mask_ref[...]                             # (N, 1) int32
    active = jnp.where(mask == 1, labels, -100)
    valid = active != -100

    m = jnp.max(logits, axis=-1, keepdims=True)
    lse = m + jnp.log(jnp.sum(jnp.exp(logits - m), axis=-1, keepdims=True))
    col = lax.broadcasted_iota(jnp.int32, logits.shape, 1)
    picked = jnp.sum(jnp.where(col == active, logits, 0.0),
                     axis=-1, keepdims=True)
    nll = jnp.where(valid, lse - picked, 0.0)        # (N, 1)
    count = jnp.sum(valid.astype(f32))
    # NOTE: NaN if count == 0, matching torch.nn.CrossEntropyLoss.
    loss_ref[...] = (jnp.sum(nll) / count).reshape(1, 1)


# --------------------------- wrappers ---------------------------------------
def _full_spec(shape):
    return pl.BlockSpec(shape, lambda l: (0,) * len(shape))


def _layer_spec(shape):
    # stacked (L, d1, d2): fetch one layer per grid step
    return pl.BlockSpec((1,) + tuple(shape[1:]), lambda l: (l, 0, 0))


def encoder_forward(x, attention_mask, enc_params):
    """Fused 6-layer encoder in a single pallas_call (grid over layers)."""
    mask_f = attention_mask.astype(jnp.float32).reshape(B, 1, S)
    in_specs = ([_full_spec((B, S, H)), _full_spec((B, 1, S))]
                + [_layer_spec(p.shape) for p in enc_params])
    return pl.pallas_call(
        encoder6_kernel,
        out_shape=jax.ShapeDtypeStruct((B, S, H), jnp.float32),
        grid=(NLAYERS,),
        in_specs=in_specs,
        out_specs=pl.BlockSpec((B, S, H), lambda l: (0, 0, 0)),
        scratch_shapes=[pltpu.VMEM((B * S, H), jnp.float32)],
        compiler_params=pltpu.CompilerParams(
            dimension_semantics=("arbitrary",)),   # sequential over layers
    )(x, mask_f, *enc_params)


def classifier_and_loss(x, labels, attention_mask, cls_w, cls_b):
    n = B * S
    logits2d, loss = pl.pallas_call(
        classifier_loss_kernel,
        out_shape=(jax.ShapeDtypeStruct((n, VOCAB), jnp.float32),
                   jax.ShapeDtypeStruct((1, 1), jnp.float32)),
    )(x.reshape(n, H), cls_w, cls_b,
      labels.reshape(n, 1).astype(jnp.int32),
      attention_mask.reshape(n, 1).astype(jnp.int32))
    return logits2d.reshape(B, S, VOCAB), loss[0, 0]


def inversion_transformer_forward(x, labels, attention_mask,
                                  enc_params, cls_w, cls_b,
                                  run_dead_encoder=False):
    """Returns (logits, loss), matching the PyTorch module's forward().

    The reference overwrites the encoder output with classifier(x), so the
    encoder is dead compute; it is skipped by default (the dominant perf win)
    and only executed (and discarded) when run_dead_encoder=True.
    """
    if run_dead_encoder:
        _ = encoder_forward(x, attention_mask, enc_params)  # discarded, as in reference
    return classifier_and_loss(x, labels, attention_mask, cls_w, cls_b)


# --------------------------- parameters --------------------------------------
def init_params(key):
    def rnd(k, shape, fan_in):
        return jax.random.normal(k, shape, jnp.float32) / math.sqrt(fan_in)

    wqkv_l, bqkv_l, wo_l, bo_l = [], [], [], []
    w1_l, b1_l, w2_l, b2_l = [], [], [], []
    g1_l, be1_l, g2_l, be2_l = [], [], [], []
    for _ in range(NLAYERS):
        key, *ks = jax.random.split(key, 9)
        in_proj_w = rnd(ks[0], (3 * H, H), H)          # PyTorch layout (3H, H)
        in_proj_b = jax.random.normal(ks[1], (3 * H,), jnp.float32) * 0.02
        out_w = rnd(ks[2], (H, H), H)
        out_b = jax.random.normal(ks[3], (H,), jnp.float32) * 0.02
        w1 = rnd(ks[4], (FF, H), H)
        b1 = jax.random.normal(ks[5], (FF,), jnp.float32) * 0.02
        w2 = rnd(ks[6], (H, FF), FF)
        b2 = jax.random.normal(ks[7], (H,), jnp.float32) * 0.02

        wqkv_l.append(in_proj_w.T)                     # (H, 3H), cols [q|k|v]
        bqkv_l.append(in_proj_b.reshape(1, 3 * H))
        wo_l.append(out_w.T)
        bo_l.append(out_b.reshape(1, H))
        w1_l.append(w1.T)
        b1_l.append(b1.reshape(1, FF))
        w2_l.append(w2.T)
        b2_l.append(b2.reshape(1, H))
        g1_l.append(jnp.ones((1, H), jnp.float32))
        be1_l.append(jnp.zeros((1, H), jnp.float32))
        g2_l.append(jnp.ones((1, H), jnp.float32))
        be2_l.append(jnp.zeros((1, H), jnp.float32))

    enc_params = tuple(jnp.stack(t) for t in
                       (wqkv_l, bqkv_l, wo_l, bo_l, w1_l, b1_l, w2_l, b2_l,
                        g1_l, be1_l, g2_l, be2_l))

    key, kw, kb = jax.random.split(key, 3)
    cls_w = rnd(kw, (VOCAB, H), H).T                   # (H, V)
    cls_b = (jax.random.normal(kb, (VOCAB,), jnp.float32) * 0.02).reshape(1, VOCAB)
    return enc_params, cls_w, cls_b


# ------------------------------ main -----------------------------------------
if __name__ == "__main__":
    root = jax.random.PRNGKey(0)
    k_x, k_lbl, k_p = jax.random.split(root, 3)

    x = jax.random.normal(k_x, (B, S, H), jnp.float32)
    labels = jax.random.randint(k_lbl, (B, S), 0, VOCAB, jnp.int32)
    attention_mask = jnp.array([[1, 1, 1, 1, 1, 0, 0, 0],
                                [1, 1, 1, 0, 0, 0, 0, 0]], jnp.int32)

    enc_params, cls_w, cls_b = init_params(k_p)

    # Optimized live path: the dead encoder is skipped.
    logits, loss = inversion_transformer_forward(
        x, labels, attention_mask, enc_params, cls_w, cls_b,
        run_dead_encoder=False)

    # Exercise the fused 6-layer encoder kernel once to verify it compiles and
    # runs (its result is discarded by the reference module).
    enc_out = encoder_forward(x, attention_mask, enc_params)

    jax.block_until_ready((logits, loss, enc_out))

    assert logits.shape == (B, S, VOCAB)
    assert loss.shape == ()
    assert enc_out.shape == (B, S, H)
    print("KERNEL_OK")
</pallas_src>

<mosaic_0001>
module attributes {stable_mosaic.version = 11 : i64} {
  func.func @classifier_loss_kernel(%arg0: memref<16x64xf32, #tpu.memory_space<vmem>>, %arg1: memref<64x128xf32, #tpu.memory_space<vmem>>, %arg2: memref<1x128xf32, #tpu.memory_space<vmem>>, %arg3: memref<16x1xi32, #tpu.memory_space<vmem>>, %arg4: memref<16x1xi32, #tpu.memory_space<vmem>>, %arg5: memref<16x128xf32, #tpu.memory_space<vmem>>, %arg6: memref<1x1xf32, #tpu.memory_space<vmem>>) attributes {dimension_semantics = [], scalar_prefetch = 0 : i64, scratch_operands = 0 : i64, tpu.core_type = #tpu.core_type<tc>} {
    %c0 = arith.constant 0 : index
    %c0_0 = arith.constant 0 : index
    %0 = vector.load %arg0[%c0, %c0_0] : memref<16x64xf32, #tpu.memory_space<vmem>>, vector<16x64xf32>
    %c0_1 = arith.constant 0 : index
    %c0_2 = arith.constant 0 : index
    %1 = vector.load %arg1[%c0_1, %c0_2] : memref<64x128xf32, #tpu.memory_space<vmem>>, vector<64x128xf32>
    %cst = arith.constant dense<0.000000e+00> : vector<16x128xf32>
    %2 = tpu.matmul %0, %1, %cst {dimension_numbers = #tpu.dot_dimension_numbers<[1], [0], [0], [1], [0, 0, 1, 1], [], []>} : vector<16x64xf32>, vector<64x128xf32>, vector<16x128xf32> -> vector<16x128xf32>
    %c0_3 = arith.constant 0 : index
    %c0_4 = arith.constant 0 : index
    %3 = vector.load %arg2[%c0_3, %c0_4] : memref<1x128xf32, #tpu.memory_space<vmem>>, vector<1x128xf32>
    %4 = vector.broadcast %3 : vector<1x128xf32> to vector<16x128xf32>
    %5 = arith.addf %2, %4 : vector<16x128xf32>
    %c0_5 = arith.constant 0 : index
    %c0_6 = arith.constant 0 : index
    %6 = vector.load %arg5[%c0_5, %c0_6] : memref<16x128xf32, #tpu.memory_space<vmem>>, vector<16x128xf32>
    tpu.vector_store %arg5[%c0_5, %c0_6], %5 {strides = array<i32>} : memref<16x128xf32, #tpu.memory_space<vmem>>, vector<16x128xf32>,
    %c0_7 = arith.constant 0 : index
    %c0_8 = arith.constant 0 : index
    %7 = vector.load %arg3[%c0_7, %c0_8] : memref<16x1xi32, #tpu.memory_space<vmem>>, vector<16x1xi32>
    %c0_9 = arith.constant 0 : index
    %c0_10 = arith.constant 0 : index
    %8 = vector.load %arg4[%c0_9, %c0_10] : memref<16x1xi32, #tpu.memory_space<vmem>>, vector<16x1xi32>
    %c1_i32 = arith.constant 1 : i32
    %9 = vector.broadcast %c1_i32 : i32 to vector<16x1xi32>
    %10 = arith.cmpi eq, %8, %9 : vector<16x1xi32>
    %c-100_i32 = arith.constant -100 : i32
    %11 = vector.broadcast %c-100_i32 : i32 to vector<16x1xi32>
    %12 = arith.select %10, %7, %11 : vector<16x1xi1>, vector<16x1xi32>
    %c-100_i32_11 = arith.constant -100 : i32
    %13 = vector.broadcast %c-100_i32_11 : i32 to vector<16x1xi32>
    %14 = arith.cmpi ne, %12, %13 : vector<16x1xi32>
    %cst_12 = arith.constant dense<0xFF800000> : vector<16xf32>
    %15 = vector.multi_reduction <maximumf>, %5, %cst_12 [1] : vector<16x128xf32> to vector<16xf32>
    %16 = vector.shape_cast %15 : vector<16xf32> to vector<16x1xf32>
    %17 = vector.broadcast %16 : vector<16x1xf32> to vector<16x128xf32>
    %18 = arith.subf %5, %17 : vector<16x128xf32>
    %19 = math.exp %18 : vector<16x128xf32>
    %cst_13 = arith.constant dense<0.000000e+00> : vector<16xf32>
    %20 = vector.multi_reduction <add>, %19, %cst_13 [1] : vector<16x128xf32> to vector<16xf32>
    %21 = vector.shape_cast %20 : vector<16xf32> to vector<16x1xf32>
    %22 = math.log %21 : vector<16x1xf32>
    %23 = arith.addf %16, %22 : vector<16x1xf32>
    %24 = tpu.iota {dimensions = array<i32: 1>} : vector<16x128xi32>
    %25 = vector.broadcast %12 : vector<16x1xi32> to vector<16x128xi32>
    %26 = arith.cmpi eq, %24, %25 : vector<16x128xi32>
    %cst_14 = arith.constant 0.000000e+00 : f32
    %27 = vector.broadcast %cst_14 : f32 to vector<16x128xf32>
    %28 = arith.select %26, %5, %27 : vector<16x128xi1>, vector<16x128xf32>
    %cst_15 = arith.constant dense<0.000000e+00> : vector<16xf32>
    %29 = vector.multi_reduction <add>, %28, %cst_15 [1] : vector<16x128xf32> to vector<16xf32>
    %30 = vector.shape_cast %29 : vector<16xf32> to vector<16x1xf32>
    %31 = arith.subf %23, %30 : vector<16x1xf32>
    %cst_16 = arith.constant 0.000000e+00 : f32
    %32 = vector.broadcast %cst_16 : f32 to vector<16x1xf32>
    %33 = arith.select %14, %31, %32 : vector<16x1xi1>, vector<16x1xf32>
    %34 = arith.extui %14 : vector<16x1xi1> to vector<16x1xi32>
    %35 = arith.sitofp %34 : vector<16x1xi32> to vector<16x1xf32>
    %36 = vector.shape_cast %35 : vector<16x1xf32> to vector<1x16x1xf32>
    %cst_17 = arith.constant dense<0.000000e+00> : vector<1xf32>
    %37 = vector.multi_reduction <add>, %36, %cst_17 [1, 2] : vector<1x16x1xf32> to vector<1xf32>
    %38 = vector.shape_cast %37 : vector<1xf32> to vector<1x1x1xf32>
    %39 = vector.extract %38[0, 0, 0] : f32 from vector<1x1x1xf32>
    %40 = vector.shape_cast %33 : vector<16x1xf32> to vector<1x16x1xf32>
    %cst_18 = arith.constant dense<0.000000e+00> : vector<1xf32>
    %41 = vector.multi_reduction <add>, %40, %cst_18 [1, 2] : vector<1x16x1xf32> to vector<1xf32>
    %42 = vector.shape_cast %41 : vector<1xf32> to vector<1x1x1xf32>
    %43 = vector.extract %42[0, 0, 0] : f32 from vector<1x1x1xf32>
    %44 = arith.divf %43, %39 : f32
    %45 = vector.broadcast %44 : f32 to vector<1x1xf32>
    %c0_19 = arith.constant 0 : index
    %c0_20 = arith.constant 0 : index
    %46 = vector.load %arg6[%c0_19, %c0_20] : memref<1x1xf32, #tpu.memory_space<vmem>>, vector<1x1xf32>
    tpu.vector_store %arg6[%c0_19, %c0_20], %45 {strides = array<i32>} : memref<1x1xf32, #tpu.memory_space<vmem>>, vector<1x1xf32>,
    return
  }
}

</mosaic_0001>

<bundles_post_ra>
// kernel: tpu_custom_call.1
= control target key start
LH: loop header
LB: loop body
LE: loop exit
PB: predicated region body
PF: predicated region fallthrough
CT: control target
= control target key end

     0   :  { %12 = vsyncpa [#allocation3], 0  ;;  %s530_s0 = inlined_call_operand.vmem [shape: f32[16,64], index: 0, kind: input, shape index: {}]   ;;  %s531_s1 = inlined_call_operand.hbm [shape: f32[64,128], index: 1, kind: input, shape index: {}]   ;;  %s532_s2 = inlined_call_operand.vmem [shape: f32[1,128], index: 2, kind: input, shape index: {}]   ;;  %s533_s3 = inlined_call_operand.vmem [shape: s32[16,1], index: 3, kind: input, shape index: {}]   ;;  %s534_s4 = inlined_call_operand.vmem [shape: s32[16,1], index: 4, kind: input, shape index: {}]   ;;  %s535_s5 = inlined_call_operand.hbm [shape: f32[16,128], index: 5, kind: output, shape index: {0}]   ;;  %s536_s6 = inlined_call_operand.hbm [shape: f32[1,1], index: 6, kind: output, shape index: {1}]  }
   0x1   :  { %13 = vsyncpa [#allocation4], 0 }
   0x2   :  { %14 = vsyncpa [#allocation7], 0  ;;  %s403_s21 = smov [#allocation2]   ;;  %s331_s25 = scalar_lea.hbm %s531_s1, 1024 }
   0x3   :  { %s22_s22 = sshll.u32 %s403_s21, 4  ;;  %p332_p0 = scmp.ne.s32.totalorder %s531_s1, %s331_s25  ;;  %s23_s22 = int_to_ptr.vmem [resolvable:$true] %s22_s22 }
   0x4   :  { %p335_p1 = scmp.lt.u32.totalorder %s331_s25, %s531_s1 }
   0x6   :  { %p337_p2 = pnand %p335_p1, %p332_p0 }
   0x8   :  { %340 = shalt.err (!%p337_p2)
}
   0x9   :  { %s341_s30 = scalar_lea.vmem %s23_s22, 1024  ;;  %p346_p4 = scmp.lt.s32.totalorder %s23_s22, %s23_s22 }
   0xa   :  { %p342_p3 = scmp.ne.s32.totalorder %s23_s22, %s341_s30  ;;  %p347_p5 = scmp.lt.s32.totalorder %s341_s30, %s341_s30 }
   0xc   :  { %p348_p6 = por %p347_p5, %p346_p4 }
   0xe   :  { %p349_p7 = pnand %p348_p6, %p342_p3 }
  0x10   :  { %352 = shalt.err (!%p349_p7)
}
  0x11   :  { %s404_s7 = smov 128   ;;  %s405_s8 = smov 8  }
  0x12   :  { %28 = dma.hbm_to_vmem [thread:$0]  %s531_s1, 1024, %s23_s22, [#allocation3], %s404_s7, %s404_s7, %s405_s8  }
  0x13   :  { %397 = dma.done.wait [#allocation3], 1024  }
  0x14   :  { %398 = vsyncadd [#allocation3], 4294966272  ;;  %v406_v0 = vmov 0   ;;  %v40_v1 = vld [vmem:[#allocation2] sm:$0xff]  ;;  %v41_v2 = vld [vmem:[#allocation2 + $0x8] sm:$0xff]  ;;  %vm55_vm0 = vcmask 523264   ;;  %v169_v32 = vlaneseq }
  0x15   :  { %319 = vset.pattern.permute.xlu1 %v406_v0  ;;  %320 = vset.pattern.permute.xlu0 %v406_v0  ;;  %v42_v3 = vld [vmem:[#allocation2 + $0x10] sm:$0xff]  ;;  %v290_v4 = vpack.c.bf16 %v41_v2, %v40_v1  ;;  %v43_v5 = vld [vmem:[#allocation2 + $0x18] sm:$0xff]  ;;  %v44_v7 = vld [vmem:[#allocation2 + $0x20] sm:$0xff]  ;;  %v407_v37 = vmov 0.0   ;;  %vm193_vm6 = vcmask 7168  }
  0x16   :  { %v294_v6 = vpack.c.bf16 %v43_v5, %v42_v3  ;;  %v45_v8 = vld [vmem:[#allocation2 + $0x28] sm:$0xff]  ;;  %v38_v9 = vld [vmem:[%s530_s0] sm:$0xff]  ;;  %v46_v16 = vld [vmem:[#allocation2 + $0x30] sm:$0xff]  ;;  %v170_v34 = vand.u32 127, %v169_v32 }
  0x17   :  { %291 = vmatprep.subr.bf16.mxu0 %v290_v4  ;;  %287 = vmatprep.mubr.msk.f32.mxu0 %vm55_vm0, %v38_v9  ;;  %v139_v10 = vld [vmem:[%s533_s3] sm:$0xff]  ;;  %v140_v12 = vld [vmem:[%s533_s3 + $0x8] sm:$0xff]  ;;  %v298_v14 = vpack.c.bf16 %v45_v8, %v44_v7  ;;  %v47_v17 = vld [vmem:[#allocation2 + $0x38] sm:$0xff] }
  0x18   :  { %v141_v11 = vld [vmem:[%s534_s4] sm:$0xff]  ;;  %293 = vmatpush3.bf16.msra.mxu0 %v290_v4  ;;  %v142_v13 = vld [vmem:[%s534_s4 + $0x8] sm:$0xff]  ;;  %v302_v19 = vpack.c.bf16 %v47_v17, %v46_v16 }
  0x19   :  { %vm143_vm1 = vcmp.eq.s32.totalorder %v141_v11, 1  ;;  %295 = vmatprep.subr.bf16.mxu0 %v294_v6  ;;  %vm144_vm2 = vcmp.eq.s32.totalorder %v142_v13, 1  ;;  %v39_v20 = vld [vmem:[%s530_s0 + $0x8] sm:$0xff]  ;;  %v256_v21 = vld [vmem:[%s532_s2] ss:$0 sm:$0xff]  ;;  %s408_s0 = smov [#allocation5]  }
  0x1a   :  { %v476_v15 = vsel %vm143_vm1, %v139_v10, 4294967196  ;;  %v479_v18 = vsel %vm144_vm2, %v140_v12, 4294967196  ;;  %s230_s2 = sshll.u32 %s408_s0, 4  ;;  %s231_s2 = int_to_ptr.vmem [resolvable:$true] %s230_s2 }
  0x1b   :  { %172 = vperm.xlu1 %319, %v476_v15   ;;  %vm147_vm3 = vcmp.ne.s32.totalorder %v476_v15, 4294967196  ;;  %vm148_vm4 = vcmp.ne.s32.totalorder %v479_v18, 4294967196  ;;  %s353_s22 = scalar_lea.vmem %s231_s2, 256  ;;  %p358_p9 = scmp.lt.s32.totalorder %s231_s2, %s231_s2 }
  0x1c   :  { %297 = vmatpush3.bf16.msra.mxu0 %v294_v6  ;;  %v259_v38 = vsel %vm147_vm3, 1.0, %v407_v37  ;;  %v260_v39 = vsel %vm148_vm4, 1.0, %v407_v37  ;;  %p354_p8 = scmp.ne.s32.totalorder %s231_s2, %s353_s22  ;;  %p359_p10 = scmp.lt.s32.totalorder %s353_s22, %s353_s22 }
  0x1d   :  { %299 = vmatprep.subr.bf16.mxu0 %v298_v14  ;;  %v194_v42 = vsel %vm193_vm6, %v259_v38, 0.0  ;;  %v195_v43 = vsel %vm193_vm6, %v260_v39, 0.0 }
  0x1e   :  { %v196_v45 = vadd.f32 %v195_v43, %v194_v42  ;;  %p360_p11 = por %p359_p10, %p358_p9 }
  0x1f   :  { %175 = vperm.xlu1 %319, %v479_v18  }
  0x20   :  { %301 = vmatpush3.bf16.msra.mxu0 %v298_v14  ;;  %p361_p12 = pnand %p360_p11, %p354_p8 }
  0x21   :  { %303 = vmatprep.subr.bf16.mxu0 %v302_v19 }
  0x24   :  { %305 = vmatpush3.bf16.msra.mxu0 %v302_v19 }
  0x27   :  { %288 = vmatmul.mubr.msk.f32.vlgmr.msra.gmra.mrb[0].mxu0 %vm55_vm0, %v39_v20 }
  0x9a   :  { %v173_v33 = vpop.permute.xlu1 %172 }
  0x9b   :  { %vm177_vm5 = vcmp.eq.s32.totalorder %v170_v34, %v173_v33 }
  0x9e   :  { %v176_v36 = vpop.permute.xlu1 %175 }
  0x9f   :  { %vm178_vm7 = vcmp.eq.s32.totalorder %v170_v34, %v176_v36 }
  0xfa   :  { %v289_v22 = vpop.f32.mrb[0].mxu0 }
  0xfb   :  { %v134_v23 = vadd.f32 %v289_v22, %v256_v21  ;;  %v128_v24 = vpop.f32.mrb[1].mxu0 }
  0xfc   :  { %v129_v25 = vadd.f32 %v256_v21, %v128_v24 }
  0xfd   :  { %138 = vst [vmem:[#allocation5 + $0x8] sm:$0xff] %v134_v23  ;;  %v180_v44 = vsel %vm178_vm7, %v134_v23, 0.0 }
  0xfe   :  { %137 = vst [vmem:[#allocation5] sm:$0xff] %v129_v25  ;;  %149 = vmax.xlane.f32.xlu0 %v129_v25  ;;  %v179_v41 = vsel %vm177_vm5, %v129_v25, 0.0 }
 0x102   :  { %151 = vmax.xlane.f32.xlu0 %v134_v23 }
 0x18b   :  { %v150_v26 = vpop.xlane.xlu0 %149 }
 0x18c   :  { %v153_v27 = vsub.f32 %v129_v25, %v150_v26 }
 0x18e   :  { %v155_v28 = vmul.f32 1.442695, %v153_v27 }
 0x18f   :  { %v152_v29 = vpop.xlane.xlu0 %151 }
 0x190   :  { %321 = vpow2.f32 %v155_v28  ;;  %v154_v30 = vsub.f32 %v134_v23, %v152_v29 }
 0x192   :  { %v157_v31 = vmul.f32 1.442695, %v154_v30 }
 0x194   :  { %323 = vpow2.f32 %v157_v31 }
 0x19a   :  { %v322_v35 = vpop.eup %321 }
 0x19b   :  { %159 = vadd.xlane.f32.xlu0 %v322_v35 }
 0x19e   :  { %v324_v40 = vpop.eup %323 }
 0x19f   :  { %161 = vadd.xlane.f32.xlu1 %v324_v40  ;;  %181 = vadd.xlane.f32.xlu0 %v179_v41 }
 0x1a3   :  { %183 = vadd.xlane.f32.xlu0 %v180_v44 }
 0x1a7   :  { %197 = vadd.xlane.f32.xlu0 %v196_v45 }
 0x228   :  { %v160_v46 = vpop.xlane.xlu0 %159 }
 0x229   :  { %325 = vlog2.f32 %v160_v46 }
 0x22c   :  { %v162_v47 = vpop.xlane.xlu1 %161  ;;  %v182_v48 = vpop.xlane.xlu0 %181 }
 0x22d   :  { %327 = vlog2.f32 %v162_v47 }
 0x230   :  { %v184_v49 = vpop.xlane.xlu0 %183 }
 0x233   :  { %v326_v50 = vpop.eup %325 }
 0x234   :  { %v164_v51 = vmul.f32 0.6931472, %v326_v50  ;;  %v198_v52 = vpop.xlane.xlu0 %197 }
 0x235   :  { %v199_v53 = vrot.slane %v198_v52, 4 }
 0x236   :  { %v167_v54 = vadd.f32 %v164_v51, %v150_v26 }
 0x237   :  { %v328_v55 = vpop.eup %327  ;;  %v200_v56 = vadd.f32 %v199_v53, %v198_v52 }
 0x238   :  { %v166_v57 = vmul.f32 0.6931472, %v328_v55  ;;  %v185_v58 = vsub.f32 %v167_v54, %v182_v48 }
 0x239   :  { %v201_v59 = vrot.slane %v200_v56, 2 }
 0x23a   :  { %v168_v60 = vadd.f32 %v166_v57, %v152_v29  ;;  %v187_v62 = vsel %vm147_vm3, %v185_v58, 0.0 }
 0x23b   :  { %v202_v61 = vadd.f32 %v201_v59, %v200_v56  ;;  %v206_v2 = vsel %vm193_vm6, %v187_v62, 0.0 }
 0x23c   :  { %v186_v63 = vsub.f32 %v168_v60, %v184_v49 }
 0x23d   :  { %v203_v0 = vrot.slane %v202_v61, 1 }
 0x23e   :  { %v188_v1 = vsel %vm148_vm4, %v186_v63, 0.0 }
 0x23f   :  { %v207_v3 = vsel %vm193_vm6, %v188_v1, 0.0  ;;  %v204_v4 = vadd.f32 %v203_v0, %v202_v61 }
 0x240   :  { %v208_v5 = vadd.f32 %v207_v3, %v206_v2 }
 0x241   :  { %306 = vpush %v204_v4 }
 0x242   :  { %209 = vadd.xlane.f32.xlu0 %v208_v5 }
 0x243   :  { %364 = shalt.err (!%p361_p12)
}
 0x244   :  { %s365_s25 = scalar_lea.hbm %s535_s5, 256 }
 0x245   :  { %p366_p13 = scmp.ne.s32.totalorder %s535_s5, %s365_s25  ;;  %p369_p0 = scmp.lt.u32.totalorder %s365_s25, %s535_s5 }
 0x247   :  { %p371_p1 = pnand %p369_p0, %p366_p13 }
 0x249   :  { %374 = shalt.err (!%p371_p1)
}
 0x24a   :  { %236 = dma.vmem_to_hbm [thread:$0]  %s231_s2, 256, %s535_s5, [#allocation4], %s404_s7, %s404_s7, %s405_s8   ;;  %vm223_vm8 = vcmask 0  }
 0x24b   :  { %s409_s12 = smov [#allocation6]  }
 0x24c   :  { %s243_s1 = sshll.u32 %s409_s12, 4  ;;  %s244_s1 = int_to_ptr.vmem [resolvable:$true] %s243_s1 }
 0x24d   :  { %s375_s5 = scalar_lea.vmem %s244_s1, 16  ;;  %s379_s7 = scalar_lea.vmem %s244_s1, 32 }
 0x24e   :  { %p376_p2 = scmp.ne.s32.totalorder %s244_s1, %s375_s5  ;;  %p380_p3 = scmp.lt.s32.totalorder %s244_s1, %s244_s1 }
 0x24f   :  { %p381_p4 = scmp.lt.s32.totalorder %s379_s7, %s375_s5 }
 0x251   :  { %p382_p5 = por %p381_p4, %p380_p3 }
 0x253   :  { %p383_p6 = pnand %p382_p5, %p376_p2 }
 0x272   :  { %s307_s10 = spop %306 }
 0x273   :  { %v218_v6 = vstv %s307_s10 }
 0x274   :  { %329 = vrcp.f32 %v218_v6 }
 0x27e   :  { %v330_v14 = vpop.eup %329 }
 0x2cf   :  { %v210_v7 = vpop.xlane.xlu0 %209 }
 0x2d0   :  { %v211_v8 = vrot.slane %v210_v7, 4 }
 0x2d2   :  { %v212_v9 = vadd.f32 %v211_v8, %v210_v7 }
 0x2d4   :  { %v213_v10 = vrot.slane %v212_v9, 2 }
 0x2d6   :  { %v214_v11 = vadd.f32 %v213_v10, %v212_v9 }
 0x2d8   :  { %v215_v12 = vrot.slane %v214_v11, 1 }
 0x2da   :  { %v216_v13 = vadd.f32 %v215_v12, %v214_v11 }
 0x2dc   :  { %308 = vpush %v216_v13 }
 0x2dd   :  { %310 = vpush %v330_v14 }
 0x30d   :  { %s309_s11 = spop %308 }
 0x30e   :  { %s311_s13 = spop %310 }
 0x30f   :  { %s221_s14 = smul.f32 %s311_s13, %s309_s11 }
 0x311   :  { %v222_v15 = vstv %s221_s14 }
 0x312   :  { %224 = vst.msk [vmem:[#allocation6] sm:$0x1] %vm223_vm8, %v222_v15 }
 0x313   :  { %386 = shalt.err (!%p383_p6)
}
 0x314   :  { %s387_s16 = scalar_lea.hbm %s536_s6, 16 }
 0x315   :  { %p388_p7 = scmp.ne.s32.totalorder %s536_s6, %s387_s16  ;;  %p391_p8 = scmp.lt.u32.totalorder %s387_s16, %s536_s6 }
 0x317   :  { %p393_p9 = pnand %p391_p8, %p388_p7 }
 0x319   :  { %396 = shalt.err (!%p393_p9)
}
 0x31a   :  { %246 = dma.vmem_to_hbm [thread:$0]  %s244_s1, 16, %s536_s6, [#allocation7]  }
 0x31b   :  { %399 = dma.done.wait [#allocation4], 256  }
 0x31c   :  { %400 = vsyncadd [#allocation4], 4294967040 }
 0x31d   :  { %401 = dma.done.wait [#allocation7], 16  }
 0x31e   :  { %402 = vsyncadd [#allocation7], 4294967280 }
 0x31f   :  { %253 = vsyncpa [#allocation3], 1 }
 0x320   :  { %254 = vsyncpa [#allocation4], 1 }
 0x321   :  { %255 = vsyncpa [#allocation7], 1 }

</bundles_post_ra>
